<compile_context>
chip_gen: v6e
topology: v6e:2x2x1
jax: 0.10.0
libtpu: 0.0.40
codegen_flags: <defaults>
</compile_context>

<pallas_src>
import jax
import jax.numpy as jnp
from jax.experimental import pallas as pl
from jax.experimental.pallas import tpu as pltpu

N_EMBD = 32     # C
HEAD_SIZE = 16  # H
SEQ_LEN = 8     # T
BATCH = 2       # B


def head_kernel(x_ref, wqkv_ref, o_ref):
    # x_ref: (B, T, C)   wqkv_ref: (C, 3H)   o_ref: (B, T, H)
    B, T, C = x_ref.shape
    H = o_ref.shape[-1]

    # Fused QKV projection: one wide matmul instead of three narrow ones.
    x2 = x_ref[...].reshape(B * T, C)                                  # (B*T, C)
    qkv = jnp.dot(x2, wqkv_ref[...],
                  preferred_element_type=jnp.float32)                  # (B*T, 3H)
    qkv = qkv.reshape(B, T, 3 * H)

    k = qkv[:, :, 0:H]           # (B, T, H)  -- static slices are free
    q = qkv[:, :, H:2 * H]
    v = qkv[:, :, 2 * H:3 * H]

    scale = C ** (-0.5)          # PyTorch scales by C, not head_size

    # Batched q @ k^T without an explicit transpose: contract last axes.
    wei = jax.lax.dot_general(
        q, k,
        dimension_numbers=(((2,), (2,)), ((0,), (0,))),
        preferred_element_type=jnp.float32) * scale                     # (B, T, T)

    # causal (lower-triangular) mask, built once (single grid step)
    row = jax.lax.broadcasted_iota(jnp.int32, (T, T), 0)
    col = jax.lax.broadcasted_iota(jnp.int32, (T, T), 1)
    mask = row >= col
    wei = jnp.where(mask[None, :, :], wei, -jnp.inf)

    # softmax over last axis (approx reciprocal -> otherwise-idle EUP slot)
    m = jnp.max(wei, axis=-1, keepdims=True)
    e = jnp.exp(wei - m)
    denom = jnp.sum(e, axis=-1, keepdims=True)
    p = e * pl.reciprocal(denom, approx=True)

    # TODO(synk): nn.Dropout(0.1) is identity in eval mode; not applied here.

    # batched p @ v
    out = jax.lax.dot_general(
        p, v,
        dimension_numbers=(((2,), (1,)), ((0,), (0,))),
        preferred_element_type=jnp.float32)                             # (B, T, H)
    o_ref[...] = out.astype(o_ref.dtype)


def head_forward(x, w_key, w_query, w_value):
    """x: (B, T, C) float32; w_*: (C, H) float32 (already transposed)."""
    B, T, C = x.shape
    H = w_key.shape[1]
    # Fuse projection weights into a single (C, 3H) matrix (order: k, q, v).
    w_qkv = jnp.concatenate([w_key, w_query, w_value], axis=1)
    # NOTE: at real sizes, make the output lane-dense (last dim a multiple of
    # 128, e.g. concatenated heads) and size blocks against 64 MiB VMEM on v7x.
    return pl.pallas_call(
        head_kernel,
        out_shape=jax.ShapeDtypeStruct((B, T, H), jnp.float32),
        grid=(1,),  # single step: whole problem fits trivially in VMEM
        in_specs=[
            pl.BlockSpec((B, T, C), lambda i: (0, 0, 0)),
            pl.BlockSpec((C, 3 * H), lambda i: (0, 0)),
        ],
        out_specs=pl.BlockSpec((B, T, H), lambda i: (0, 0, 0)),
        compiler_params=pltpu.CompilerParams(
            dimension_semantics=("arbitrary",)),
    )(x, w_qkv)


if __name__ == "__main__":
    key = jax.random.PRNGKey(0)
    kx, kk, kq, kv = jax.random.split(key, 4)

    x = jax.random.normal(kx, (BATCH, SEQ_LEN, N_EMBD), dtype=jnp.float32)

    # nn.Linear(n_embd, head_size, bias=False) weights: (H, C) in PyTorch.
    # We store the transpose (C, H) so the kernel computes x @ W directly.
    bound = 1.0 / (N_EMBD ** 0.5)  # PyTorch default uniform(-1/sqrt(fan_in), ...)
    w_key = jax.random.uniform(kk, (N_EMBD, HEAD_SIZE), jnp.float32, -bound, bound)
    w_query = jax.random.uniform(kq, (N_EMBD, HEAD_SIZE), jnp.float32, -bound, bound)
    w_value = jax.random.uniform(kv, (N_EMBD, HEAD_SIZE), jnp.float32, -bound, bound)

    out = head_forward(x, w_key, w_query, w_value)
    jax.block_until_ready(out)

    # pure-JAX reference check
    def ref(x, wk, wq, wv):
        k = x @ wk
        q = x @ wq
        v = x @ wv
        wei = (q @ jnp.swapaxes(k, -2, -1)) * (N_EMBD ** -0.5)
        mask = jnp.tril(jnp.ones((SEQ_LEN, SEQ_LEN)))
        wei = jnp.where(mask == 0, -jnp.inf, wei)
        wei = jax.nn.softmax(wei, axis=-1)
        return wei @ v

    expected = ref(x, w_key, w_query, w_value)
    # slightly looser tolerance: approx reciprocal in the softmax normalization
    assert jnp.allclose(out, expected, atol=5e-3, rtol=5e-3), "mismatch vs reference"
    print("KERNEL_OK")
</pallas_src>

<mosaic_0001>
module attributes {stable_mosaic.version = 11 : i64} {
  func.func @head_kernel(%arg0: i32, %arg1: memref<2x8x32xf32, #tpu.memory_space<vmem>>, %arg2: memref<32x48xf32, #tpu.memory_space<vmem>>, %arg3: memref<2x8x16xf32, #tpu.memory_space<vmem>>) attributes {dimension_semantics = [#tpu.dimension_semantics<arbitrary>], iteration_bounds = array<i64: 1>, scalar_prefetch = 0 : i64, scratch_operands = 0 : i64, tpu.core_type = #tpu.core_type<tc>, window_params = [{pipeline_mode = #tpu.pipeline_mode<synchronous>, transform_indices = @transform_0, window_bounds = array<i64: 2, 8, 32>}, {pipeline_mode = #tpu.pipeline_mode<synchronous>, transform_indices = @transform_1, window_bounds = array<i64: 32, 48>}, {pipeline_mode = #tpu.pipeline_mode<synchronous>, transform_indices = @transform_2, window_bounds = array<i64: 2, 8, 16>}]} {
    %c0 = arith.constant 0 : index
    %c0_0 = arith.constant 0 : index
    %c0_1 = arith.constant 0 : index
    %0 = vector.load %arg1[%c0, %c0_0, %c0_1] : memref<2x8x32xf32, #tpu.memory_space<vmem>>, vector<2x8x32xf32>
    %1 = vector.shape_cast %0 : vector<2x8x32xf32> to vector<16x32xf32>
    %c0_2 = arith.constant 0 : index
    %c0_3 = arith.constant 0 : index
    %2 = vector.load %arg2[%c0_2, %c0_3] : memref<32x48xf32, #tpu.memory_space<vmem>>, vector<32x48xf32>
    %cst = arith.constant dense<0.000000e+00> : vector<16x48xf32>
    %3 = tpu.matmul %1, %2, %cst {dimension_numbers = #tpu.dot_dimension_numbers<[1], [0], [0], [1], [0, 0, 1, 1], [], []>} : vector<16x32xf32>, vector<32x48xf32>, vector<16x48xf32> -> vector<16x48xf32>
    %4 = vector.shape_cast %3 : vector<16x48xf32> to vector<2x8x48xf32>
    %5 = vector.extract_strided_slice %4 {offsets = [0, 0, 0], sizes = [2, 8, 16], strides = [1, 1, 1]} : vector<2x8x48xf32> to vector<2x8x16xf32>
    %6 = vector.extract_strided_slice %4 {offsets = [0, 0, 16], sizes = [2, 8, 16], strides = [1, 1, 1]} : vector<2x8x48xf32> to vector<2x8x16xf32>
    %7 = vector.extract_strided_slice %4 {offsets = [0, 0, 32], sizes = [2, 8, 16], strides = [1, 1, 1]} : vector<2x8x48xf32> to vector<2x8x16xf32>
    %cst_4 = arith.constant dense<0.000000e+00> : vector<2x8x8xf32>
    %8 = tpu.matmul %6, %5, %cst_4 {dimension_numbers = #tpu.dot_dimension_numbers<[2], [2], [1], [1], [0, 0, 0, 1, 1, 1], [0], [0]>} : vector<2x8x16xf32>, vector<2x8x16xf32>, vector<2x8x8xf32> -> vector<2x8x8xf32>
    %cst_5 = arith.constant 0.176776692 : f32
    %9 = vector.broadcast %cst_5 : f32 to vector<2x8x8xf32>
    %10 = arith.mulf %8, %9 : vector<2x8x8xf32>
    %11 = tpu.iota {dimensions = array<i32: 0>} : vector<8x8xi32>
    %12 = tpu.iota {dimensions = array<i32: 1>} : vector<8x8xi32>
    %13 = arith.cmpi sge, %11, %12 : vector<8x8xi32>
    %14 = vector.shape_cast %13 : vector<8x8xi1> to vector<1x8x8xi1>
    %cst_6 = arith.constant 0xFF800000 : f32
    %15 = vector.shape_cast %14 : vector<1x8x8xi1> to vector<1x8x8xi1>
    %16 = vector.broadcast %15 : vector<1x8x8xi1> to vector<2x8x8xi1>
    %17 = vector.broadcast %cst_6 : f32 to vector<2x8x8xf32>
    %18 = arith.select %16, %10, %17 : vector<2x8x8xi1>, vector<2x8x8xf32>
    %cst_7 = arith.constant dense<0xFF800000> : vector<2x8xf32>
    %19 = vector.multi_reduction <maximumf>, %18, %cst_7 [2] : vector<2x8x8xf32> to vector<2x8xf32>
    %20 = vector.shape_cast %19 : vector<2x8xf32> to vector<2x8x1xf32>
    %21 = vector.broadcast %20 : vector<2x8x1xf32> to vector<2x8x8xf32>
    %22 = arith.subf %18, %21 : vector<2x8x8xf32>
    %23 = math.exp %22 : vector<2x8x8xf32>
    %cst_8 = arith.constant dense<0.000000e+00> : vector<2x8xf32>
    %24 = vector.multi_reduction <add>, %23, %cst_8 [2] : vector<2x8x8xf32> to vector<2x8xf32>
    %25 = vector.shape_cast %24 : vector<2x8xf32> to vector<2x8x1xf32>
    %26 = tpu.reciprocal %25 {approx = true} : vector<2x8x1xf32> -> vector<2x8x1xf32>
    %27 = vector.broadcast %26 : vector<2x8x1xf32> to vector<2x8x8xf32>
    %28 = arith.mulf %23, %27 : vector<2x8x8xf32>
    %cst_9 = arith.constant dense<0.000000e+00> : vector<2x8x16xf32>
    %29 = tpu.matmul %28, %7, %cst_9 {dimension_numbers = #tpu.dot_dimension_numbers<[2], [1], [1], [2], [0, 0, 0, 1, 1, 2], [0], [0]>} : vector<2x8x8xf32>, vector<2x8x16xf32>, vector<2x8x16xf32> -> vector<2x8x16xf32>
    %c0_10 = arith.constant 0 : index
    %c0_11 = arith.constant 0 : index
    %c0_12 = arith.constant 0 : index
    %30 = vector.load %arg3[%c0_10, %c0_11, %c0_12] : memref<2x8x16xf32, #tpu.memory_space<vmem>>, vector<2x8x16xf32>
    tpu.vector_store %arg3[%c0_10, %c0_11, %c0_12], %29 {strides = array<i32>} : memref<2x8x16xf32, #tpu.memory_space<vmem>>, vector<2x8x16xf32>,
    return
  }
  func.func @transform_0(%arg0: i32) -> (i32, i32, i32) {
    %c0_i32 = arith.constant 0 : i32
    %c0_i32_0 = arith.constant 0 : i32
    %c0_i32_1 = arith.constant 0 : i32
    %c0_i32_2 = arith.constant 0 : i32
    return %c0_i32, %c0_i32_0, %c0_i32_1 : i32, i32, i32
  }
  func.func @transform_1(%arg0: i32) -> (i32, i32) {
    %c0_i32 = arith.constant 0 : i32
    %c0_i32_0 = arith.constant 0 : i32
    %c0_i32_1 = arith.constant 0 : i32
    return %c0_i32, %c0_i32_0 : i32, i32
  }
  func.func @transform_2(%arg0: i32) -> (i32, i32, i32) {
    %c0_i32 = arith.constant 0 : i32
    %c0_i32_0 = arith.constant 0 : i32
    %c0_i32_1 = arith.constant 0 : i32
    %c0_i32_2 = arith.constant 0 : i32
    return %c0_i32, %c0_i32_0, %c0_i32_1 : i32, i32, i32
  }
}

</mosaic_0001>

<bundles_post_ra>
// kernel: tpu_custom_call.1
= control target key start
LH: loop header
LB: loop body
LE: loop exit
PB: predicated region body
PF: predicated region fallthrough
CT: control target
= control target key end

     0   :  { %7 = vsyncpa [#allocation3], 0  ;;  %s685_s0 = inlined_call_operand.hbm [shape: f32[2,8,32], index: 0, kind: input, shape index: {}]   ;;  %s686_s1 = inlined_call_operand.hbm [shape: f32[32,48], index: 1, kind: input, shape index: {}]   ;;  %s687_s2 = inlined_call_operand.hbm [shape: f32[2,8,16], index: 2, kind: output, shape index: {}]  }
   0x1   :  { %8 = vsyncpa [#allocation6], 0 }
   0x2   :  { %9 = vsyncpa [#allocation4], 0  ;;  %s625_s9 = smov [#allocation2]  }
   0x3   :  { %s15_s10 = sshll.u32 %s625_s9, 4  ;;  %s16_s10 = int_to_ptr.vmem [resolvable:$true] %s15_s10 }
   0x4   :  { %s567_s11 = scalar_lea.vmem %s16_s10, 256  ;;  %p572_p1 = scmp.lt.s32.totalorder %s16_s10, %s16_s10 }
   0x5   :  { %p568_p0 = scmp.ne.s32.totalorder %s16_s10, %s567_s11  ;;  %p573_p2 = scmp.lt.s32.totalorder %s567_s11, %s567_s11 }
   0x7   :  { %p574_p3 = por %p573_p2, %p572_p1 }
   0x9   :  { %p575_p4 = pnand %p574_p3, %p568_p0 }
   0xb   :  { %578 = shalt.err (!%p575_p4)
}
   0xc   :  { %s626_s12 = smov 128   ;;  %s627_s13 = smov 8  }
   0xd   :  { %21 = dma.hbm_to_vmem [thread:$0]  %s685_s0, 256, %s16_s10, [#allocation3], %s626_s12, %s626_s12, %s627_s13  }
   0xe   :  { %s628_s16 = smov [#allocation5]  }
   0xf   :  { %s27_s17 = sshll.u32 %s628_s16, 4  ;;  %s28_s17 = int_to_ptr.vmem [resolvable:$true] %s27_s17 }
  0x10   :  { %s587_s18 = scalar_lea.vmem %s28_s17, 512  ;;  %p592_p6 = scmp.lt.s32.totalorder %s28_s17, %s28_s17 }
  0x11   :  { %p588_p5 = scmp.ne.s32.totalorder %s28_s17, %s587_s18  ;;  %p593_p7 = scmp.lt.s32.totalorder %s587_s18, %s587_s18 }
  0x13   :  { %p594_p8 = por %p593_p7, %p592_p6 }
  0x15   :  { %p595_p9 = pnand %p594_p8, %p588_p5 }
  0x17   :  { %598 = shalt.err (!%p595_p9)
}
  0x18   :  { %33 = dma.hbm_to_vmem [thread:$0]  %s686_s1, 512, %s28_s17, [#allocation6], %s626_s12, %s626_s12, %s627_s13  }
  0x19   :  { %619 = dma.done.wait [#allocation3], 256  }
  0x1a   :  { %620 = vsyncadd [#allocation3], 4294967040 }
  0x1b   :  { %621 = dma.done.wait [#allocation6], 512  }
  0x1c   :  { %622 = vsyncadd [#allocation6], 4294966784  ;;  %vm46_vm0 = vcmask 261120   ;;  %v45_v0 = vld [vmem:[#allocation5 + $0x18] sm:$0xff]  ;;  %v44_v1 = vld [vmem:[#allocation5 + $0x10] sm:$0xff]  ;;  %v629_v6 = vmov 0.0   ;;  %v285_v11 = vlaneseq }
  0x1d   :  { %511 = vmatprep.subr.mxu0 %v45_v0  ;;  %v40_v2 = vld [vmem:[#allocation2] sm:$0xff]  ;;  %v43_v3 = vld [vmem:[#allocation5 + $0x8] sm:$0xff]  ;;  %v42_v4 = vld [vmem:[#allocation5] sm:$0xff]  ;;  %522 = vmatprep.subr.mxu1 %v629_v6  ;;  %vm630_vm1 = vmmov 0   ;;  %vm131_vm2 = vcmask 130048   ;;  %s631_s0 = smov 112  }
  0x1e   :  { %512 = vmatpush3.msra.mxu0 %v45_v0  ;;  %519 = vmatprep.mubr.msk.f32.mxu0 %vm46_vm0, %v40_v2  ;;  %v41_v5 = vld [vmem:[#allocation2 + $0x8] sm:$0xff]  ;;  %v286_v12 = vshrl.u32 %v285_v11, 7  ;;  %v288_v13 = vand.u32 127, %v285_v11  ;;  %vm294_vm4 = vcmask 64512   ;;  %s632_s1 = smov 96   ;;  %s633_s21 = smov [#allocation7]  }
  0x1f   :  { %513 = vmatprep.subr.mxu0 %v44_v1  ;;  %524 = vmatprep.mubr.msk.f32.mxu1 %vm630_vm1, %v629_v6  ;;  %s476_s22 = sshll.u32 %s633_s21, 4  ;;  %s477_s22 = int_to_ptr.vmem [resolvable:$true] %s476_s22 }
  0x20   :  { %514 = vmatpush3.msra.mxu0 %v44_v1  ;;  %vm289_vm3 = vcmp.ge.s32.totalorder %v286_v12, %v288_v13  ;;  %s599_s23 = scalar_lea.vmem %s477_s22, 256  ;;  %p604_p11 = scmp.lt.s32.totalorder %s477_s22, %s477_s22 }
  0x21   :  { %515 = vmatprep.subr.mxu0 %v43_v3  ;;  %p600_p10 = scmp.ne.s32.totalorder %s477_s22, %s599_s23  ;;  %p605_p12 = scmp.lt.s32.totalorder %s599_s23, %s599_s23 }
  0x22   :  { %516 = vmatpush3.msra.mxu0 %v43_v3 }
  0x23   :  { %517 = vmatprep.subr.mxu0 %v42_v4  ;;  %p606_p13 = por %p605_p12, %p604_p11 }
  0x24   :  { %518 = vmatpush3.msra.mxu0 %v42_v4 }
  0x25   :  { %520 = vmatmul.mubr.msk.f32.vlgmr.msra.gmra.mxu0 %vm46_vm0, %v41_v5  ;;  %532 = vmatprep.subr.mxu0 %v629_v6  ;;  %p607_p0 = pnand %p606_p13, %p600_p10 }
  0x26   :  { %534 = vmatprep.mubr.msk.f32.mxu0 %vm630_vm1, %v629_v6 }
  0xe5   :  { %v521_v7 = vpop.f32.mrf.mxu0 }
  0xe7   :  { %v119_v8 = vpop.f32.mrf.mxu0 }
  0xe8   :  { %129 = vrot.lane.b32.xlu0 %v119_v8, %s631_s0  ;;  %523 = vmatpush3.xpose.msk.msra.mxu1 %vm131_vm2, %v119_v8 }
  0xe9   :  { %527 = vmatprep.subr.mxu1 %v629_v6 }
  0xec   :  { %207 = vrot.lane.b32.xlu0 %v521_v7, %s631_s0 }
 0x15a   :  { %v130_v9 = vpop.permute.xlu0 %129 }
 0x15b   :  { %525 = vmatmul.mubr.msk.f32.vlgmr.msra.gmra.mxu1 %vm131_vm2, %v130_v9 }
 0x15c   :  { %528 = vmatpush3.xpose.msk.msra.mxu1 %vm131_vm2, %v521_v7  ;;  %529 = vmatprep.mubr.msk.f32.mxu1 %vm630_vm1, %v629_v6 }
 0x15d   :  { %537 = vmatprep.subr.mxu1 %v629_v6 }
 0x15e   :  { %v208_v10 = vpop.permute.xlu0 %207 }
 0x15f   :  { %530 = vmatmul.mubr.msk.f32.vlgmr.msra.gmra.mxu1 %vm131_vm2, %v208_v10 }
 0x160   :  { %539 = vmatprep.mubr.msk.f32.mxu1 %vm630_vm1, %v629_v6 }
 0x21b   :  { %v202_v14 = vpop.f32.mrf.mxu1 }
 0x21c   :  { %v283_v15 = vmul.f32 0.17677669, %v202_v14 }
 0x21d   :  { %v526_v16 = vpop.f32.mrf.mxu1 }
 0x21e   :  { %v292_v17 = vsel %vm289_vm3, %v283_v15, -inf }
 0x21f   :  { %v279_v18 = vpop.f32.mrf.mxu1  ;;  %v295_v19 = vsel %vm294_vm4, %v292_v17, -inf }
 0x220   :  { %v284_v20 = vmul.f32 0.17677669, %v279_v18  ;;  %296 = vmax.xlane.f32.xlu1 %v295_v19 }
 0x221   :  { %v531_v21 = vpop.f32.mrf.mxu1 }
 0x222   :  { %v293_v22 = vsel %vm289_vm3, %v284_v20, -inf }
 0x223   :  { %v298_v23 = vsel %vm294_vm4, %v293_v22, -inf }
 0x224   :  { %299 = vmax.xlane.f32.xlu1 %v298_v23 }
 0x235   :  { %317 = vrot.lane.b32.xlu1 %v119_v8, %s632_s1 }
 0x2a9   :  { %v297_v24 = vpop.xlane.xlu1 %296 }
 0x2aa   :  { %v301_v25 = vsub.f32 %v292_v17, %v297_v24 }
 0x2ac   :  { %v303_v26 = vmul.f32 1.442695, %v301_v25 }
 0x2ad   :  { %v300_v27 = vpop.xlane.xlu1 %299 }
 0x2ae   :  { %551 = vpow2.f32 %v303_v26  ;;  %v302_v28 = vsub.f32 %v293_v22, %v300_v27 }
 0x2b0   :  { %v305_v29 = vmul.f32 1.442695, %v302_v28 }
 0x2b1   :  { %v318_v30 = vpop.permute.xlu1 %317 }
 0x2b2   :  { %553 = vpow2.f32 %v305_v29  ;;  %533 = vmatpush3.msra.mxu0 %v318_v30 }
 0x2bb   :  { %v552_v31 = vpop.eup %551 }
 0x2bc   :  { %v307_v32 = vsel %vm294_vm4, %v552_v31, 0.0 }
 0x2bd   :  { %308 = vadd.xlane.f32.xlu0 %v307_v32 }
 0x2bf   :  { %v554_v33 = vpop.eup %553 }
 0x2c0   :  { %v310_v34 = vsel %vm294_vm4, %v554_v33, 0.0 }
 0x2c1   :  { %311 = vadd.xlane.f32.xlu1 %v310_v34 }
 0x2d2   :  { %393 = vrot.lane.b32.xlu1 %v521_v7, %s632_s1 }
 0x346   :  { %v309_v35 = vpop.xlane.xlu0 %308 }
 0x347   :  { %555 = vrcp.f32 %v309_v35 }
 0x34a   :  { %v312_v36 = vpop.xlane.xlu1 %311 }
 0x34b   :  { %557 = vrcp.f32 %v312_v36 }
 0x34e   :  { %v394_v37 = vpop.permute.xlu1 %393 }
 0x34f   :  { %538 = vmatpush3.msra.mxu1 %v394_v37 }
 0x354   :  { %v556_v38 = vpop.eup %555 }
 0x355   :  { %v315_v39 = vmul.f32 %v556_v38, %v552_v31 }
 0x357   :  { %535 = vmatmul.mubr.msk.f32.vlgmr.msra.gmra.mxu0 %vm294_vm4, %v315_v39 }
 0x358   :  { %v558_v40 = vpop.eup %557 }
 0x359   :  { %v316_v41 = vmul.f32 %v558_v40, %v554_v33 }
 0x35b   :  { %540 = vmatmul.mubr.msk.f32.vlgmr.msra.gmra.mxu1 %vm294_vm4, %v316_v41 }
 0x417   :  { %v389_v42 = vpop.f32.mrf.mxu0 }
 0x418   :  { %469 = vst.msk [vmem:[#allocation7] sm:$0xff] %vm131_vm2, %v389_v42 }
 0x419   :  { %v536_v43 = vpop.f32.mrf.mxu0 }
 0x41b   :  { %v465_v44 = vpop.f32.mrf.mxu1 }
 0x41c   :  { %470 = vst.msk [vmem:[#allocation7 + $0x8] sm:$0xff] %vm131_vm2, %v465_v44 }
 0x41d   :  { %v541_v45 = vpop.f32.mrf.mxu1 }
 0x41e   :  { %610 = shalt.err (!%p607_p0)
}
 0x41f   :  { %482 = dma.vmem_to_hbm [thread:$0]  %s477_s22, 256, %s687_s2, [#allocation4], %s626_s12, %s626_s12, %s627_s13  }
 0x420   :  { %623 = dma.done.wait [#allocation4], 256  }
 0x421   :  { %624 = vsyncadd [#allocation4], 4294967040 }
 0x422   :  { %486 = vsyncpa [#allocation3], 1 }
 0x423   :  { %487 = vsyncpa [#allocation6], 1 }
 0x424   :  { %488 = vsyncpa [#allocation4], 1 }

</bundles_post_ra>
